<compile_context>
chip_gen: v7x
topology: tpu7x:2x2x1
jax: 0.10.0
libtpu: 0.0.40
codegen_flags: <defaults>
</compile_context>

<pallas_src>
import functools
import numpy as np
import jax
import jax.numpy as jnp
from jax.experimental import pallas as pl
from jax.experimental.pallas import tpu as pltpu


def encoder_layer_kernel(
    x_ref,
    wqkv_ref, bqkv_ref,
    wo_ref, bo_ref,
    ln1_g_ref, ln1_b_ref,
    w1_ref, b1_ref, w2_ref, b2_ref,
    ln2_g_ref, ln2_b_ref,
    out_ref,
    q_scr, k_scr, v_scr,
    *, heads, d_k, eps, q_tile,
):
    d_model = heads * d_k
    qi = pl.program_id(1)

    # ---- fused QKV projection for the full sequence, once per batch element ----
    @pl.when(qi == 0)
    def _():
        x_full = x_ref[0].astype(jnp.bfloat16)                      # (S, D) bf16 MXU feed
        qkv = jnp.dot(x_full, wqkv_ref[...],
                      preferred_element_type=jnp.float32) + bqkv_ref[...]
        qkv = qkv.astype(jnp.bfloat16)
        q_scr[...] = qkv[:, :d_model]            # 1/sqrt(d_k) pre-folded into Wq / bq
        k_scr[...] = qkv[:, d_model:2 * d_model]
        v_scr[...] = qkv[:, 2 * d_model:]

    row0 = pl.multiple_of(qi * q_tile, q_tile)
    x_q = x_ref[0, pl.ds(row0, q_tile), :].astype(jnp.float32)      # (TQ, D) residual path
    q = q_scr[pl.ds(row0, q_tile), :]                               # (TQ, D) bf16
    k = k_scr[...]                                                  # (S,  D) bf16
    v = v_scr[...]                                                  # (S,  D) bf16

    # ---- per-head attention; head outputs folded straight into the output projection
    #      (serial accumulation -> no concat, no list of live per-head buffers) ----
    # TODO(synk): optional boolean attention mask (masked_fill_) is not plumbed through.
    attn = jnp.zeros((q_tile, d_model), jnp.float32)
    for h in range(heads):
        lo = h * d_k
        qh = q[:, lo:lo + d_k]                                      # (TQ, d_k) bf16
        kh = k[:, lo:lo + d_k]                                      # (S,  d_k) bf16
        vh = v[:, lo:lo + d_k]
        s = jnp.dot(qh, kh.T, preferred_element_type=jnp.float32)   # (TQ, S) f32 scores
        s = s - jnp.max(s, axis=-1, keepdims=True)                  # stable softmax (f32)
        p = jnp.exp(s)
        p = p * pl.reciprocal(jnp.sum(p, axis=-1, keepdims=True), approx=True)  # EUP vrcp
        ctx = jnp.dot(p.astype(jnp.bfloat16), vh,
                      preferred_element_type=jnp.float32)           # (TQ, d_k)
        attn = attn + jnp.dot(ctx.astype(jnp.bfloat16), wo_ref[lo:lo + d_k, :],
                              preferred_element_type=jnp.float32)
    attn = attn + bo_ref[...]

    # ---- residual + LayerNorm 1 (f32) ----
    y = attn + x_q
    mu = jnp.mean(y, axis=-1, keepdims=True)
    var = jnp.mean((y - mu) ** 2, axis=-1, keepdims=True)
    y = (y - mu) * jax.lax.rsqrt(var + eps) * ln1_g_ref[...] + ln1_b_ref[...]

    # ---- FFN: linear2(relu(linear1(y))); activations only TQ rows wide ----
    h1 = jnp.dot(y.astype(jnp.bfloat16), w1_ref[...],
                 preferred_element_type=jnp.float32) + b1_ref[...]
    h1 = jnp.maximum(h1, 0.0)
    f = jnp.dot(h1.astype(jnp.bfloat16), w2_ref[...],
                preferred_element_type=jnp.float32) + b2_ref[...]

    # ---- residual + LayerNorm 2 (f32) ----
    z = f + y
    mu2 = jnp.mean(z, axis=-1, keepdims=True)
    var2 = jnp.mean((z - mu2) ** 2, axis=-1, keepdims=True)
    z = (z - mu2) * jax.lax.rsqrt(var2 + eps) * ln2_g_ref[...] + ln2_b_ref[...]

    out_ref[0] = z.astype(out_ref.dtype)


def _pick_q_tile(seq_len):
    for t in (256, 128, 64, 32, 16, 8):
        if seq_len % t == 0:
            return min(t, seq_len)
    return seq_len  # tiny / odd sequences: single full-sequence tile


def transformer_encoder_layer(x, params, *, heads, eps):
    B, S, D = x.shape
    d_ff = params["w1"].shape[1]
    d_k = D // heads
    q_tile = _pick_q_tile(S)
    nq = S // q_tile

    kernel = functools.partial(encoder_layer_kernel,
                               heads=heads, d_k=d_k, eps=eps, q_tile=q_tile)

    const = lambda shape: pl.BlockSpec(shape, lambda b, qi: (0, 0))  # grid-invariant block

    return pl.pallas_call(
        kernel,
        out_shape=jax.ShapeDtypeStruct((B, S, D), x.dtype),
        grid_spec=pltpu.PrefetchScalarGridSpec(
            num_scalar_prefetch=0,
            grid=(B, nq),
            in_specs=[
                pl.BlockSpec((1, S, D), lambda b, qi: (b, 0, 0)),    # x (full seq per b)
                const((D, 3 * D)), const((1, 3 * D)),                # fused Wqkv (bf16), bqkv
                const((D, D)), const((1, D)),                        # Wo (bf16), bo
                const((1, D)), const((1, D)),                        # ln1 gamma/beta
                const((D, d_ff)), const((1, d_ff)),                  # W1 (bf16), b1
                const((d_ff, D)), const((1, D)),                     # W2 (bf16), b2
                const((1, D)), const((1, D)),                        # ln2 gamma/beta
            ],
            out_specs=pl.BlockSpec((1, q_tile, D), lambda b, qi: (b, qi, 0)),
            scratch_shapes=[
                pltpu.VMEM((S, D), jnp.bfloat16),   # Q (pre-scaled), full sequence
                pltpu.VMEM((S, D), jnp.bfloat16),   # K
                pltpu.VMEM((S, D), jnp.bfloat16),   # V
            ],
        ),
        compiler_params=pltpu.CompilerParams(
            # batch axis feeds megacore; the query-tile axis reuses the Q/K/V scratch
            # written at qi == 0, so it must stay "arbitrary".
            dimension_semantics=("parallel", "arbitrary"),
            # explicit scoped-VMEM ceiling: below v7x's 64 MiB physical VMEM, above the
            # 16/32 MiB defaults on v5e/v6e.
            vmem_limit_bytes=48 * 1024 * 1024,
        ),
    )(
        x,
        params["wqkv"], params["bqkv"],
        params["wo"], params["bo"],
        params["ln1_g"], params["ln1_b"],
        params["w1"], params["b1"], params["w2"], params["b2"],
        params["ln2_g"], params["ln2_b"],
    )


def init_params(key, d_model, d_ff):
    # torch-style Linear init; weights stored (in, out) so the kernel computes x @ W.
    # Weights are pre-rounded to bf16 precision so the f32 reference and the bf16
    # kernel share identical weight values.
    ks = jax.random.split(key, 6)

    def lin(k, fan_in, fan_out):
        bound = 1.0 / np.sqrt(fan_in)
        w = jax.random.uniform(k, (fan_in, fan_out), jnp.float32, -bound, bound)
        b = jax.random.uniform(jax.random.fold_in(k, 1), (1, fan_out),
                               jnp.float32, -bound, bound)
        return w.astype(jnp.bfloat16).astype(jnp.float32), b

    wq, bq = lin(ks[0], d_model, d_model)
    wk, bk = lin(ks[1], d_model, d_model)
    wv, bv = lin(ks[2], d_model, d_model)
    wo, bo = lin(ks[3], d_model, d_model)
    w1, b1 = lin(ks[4], d_model, d_ff)
    w2, b2 = lin(ks[5], d_ff, d_model)
    return dict(
        wq=wq, bq=bq, wk=wk, bk=bk, wv=wv, bv=bv, wo=wo, bo=bo,
        w1=w1, b1=b1, w2=w2, b2=b2,
        ln1_g=jnp.ones((1, d_model), jnp.float32),
        ln1_b=jnp.zeros((1, d_model), jnp.float32),
        ln2_g=jnp.ones((1, d_model), jnp.float32),
        ln2_b=jnp.zeros((1, d_model), jnp.float32),
    )


def pack_params(p, heads):
    # Kernel-side layout: QKV fused into one (D, 3D) weight with 1/sqrt(d_k) folded into
    # the Q columns/bias; matmul weights stored bf16 (MXU-native); biases + LN in f32.
    d_model = p["wq"].shape[0]
    d_k = d_model // heads
    scale = 1.0 / np.sqrt(d_k)
    wqkv = jnp.concatenate([p["wq"] * scale, p["wk"], p["wv"]], axis=1)
    bqkv = jnp.concatenate([p["bq"] * scale, p["bk"], p["bv"]], axis=1)
    return dict(
        wqkv=wqkv.astype(jnp.bfloat16),
        bqkv=bqkv.astype(jnp.float32),
        wo=p["wo"].astype(jnp.bfloat16), bo=p["bo"],
        w1=p["w1"].astype(jnp.bfloat16), b1=p["b1"],
        w2=p["w2"].astype(jnp.bfloat16), b2=p["b2"],
        ln1_g=p["ln1_g"], ln1_b=p["ln1_b"],
        ln2_g=p["ln2_g"], ln2_b=p["ln2_b"],
    )


def reference_forward(x, p, heads, eps):
    # pure-JAX f32 reference mirroring the PyTorch module (dropout = identity)
    B, S, D = x.shape
    d_k = D // heads
    q = x @ p["wq"] + p["bq"]
    k = x @ p["wk"] + p["bk"]
    v = x @ p["wv"] + p["bv"]

    def split(t):
        return t.reshape(B, S, heads, d_k).transpose(0, 2, 1, 3)

    q, k, v = split(q), split(k), split(v)
    s = jnp.einsum("bhqd,bhkd->bhqk", q, k) / np.sqrt(d_k)
    a = jax.nn.softmax(s, axis=-1)
    o = jnp.einsum("bhqk,bhkd->bhqd", a, v).transpose(0, 2, 1, 3).reshape(B, S, D)
    o = o @ p["wo"] + p["bo"]

    def ln(t, g, b):
        mu = t.mean(-1, keepdims=True)
        var = ((t - mu) ** 2).mean(-1, keepdims=True)
        return (t - mu) * jax.lax.rsqrt(var + eps) * g + b

    y = ln(o + x, p["ln1_g"], p["ln1_b"])
    f = jnp.maximum(y @ p["w1"] + p["b1"], 0.0) @ p["w2"] + p["b2"]
    return ln(f + y, p["ln2_g"], p["ln2_b"])


if __name__ == "__main__":
    B, S, D_MODEL, D_FF, HEADS = 2, 8, 32, 64, 4
    EPS = 1e-5

    key = jax.random.PRNGKey(0)
    kx, kp = jax.random.split(key)
    x = jax.random.normal(kx, (B, S, D_MODEL), dtype=jnp.float32)
    raw_params = init_params(kp, D_MODEL, D_FF)
    kernel_params = pack_params(raw_params, HEADS)

    out = transformer_encoder_layer(x, kernel_params, heads=HEADS, eps=EPS)
    out = jax.block_until_ready(out)

    ref = reference_forward(x, raw_params, HEADS, EPS)
    err = float(np.max(np.abs(np.asarray(out) - np.asarray(ref))))
    # bf16 MXU operands + approx reciprocal -> tolerance loosened vs pure-f32 path.
    assert np.allclose(np.asarray(out), np.asarray(ref), atol=2e-2, rtol=2e-2), (
        f"Pallas kernel output mismatch vs JAX reference (max abs diff {err:.3e})")
    print("KERNEL_OK")
</pallas_src>

<mosaic_0001>
module attributes {stable_mosaic.version = 11 : i64} {
  func.func @encoder_layer_kernel(%arg0: i32, %arg1: i32, %arg2: memref<1x8x32xf32, #tpu.memory_space<vmem>>, %arg3: memref<32x96xbf16, #tpu.memory_space<vmem>>, %arg4: memref<1x96xf32, #tpu.memory_space<vmem>>, %arg5: memref<32x32xbf16, #tpu.memory_space<vmem>>, %arg6: memref<1x32xf32, #tpu.memory_space<vmem>>, %arg7: memref<1x32xf32, #tpu.memory_space<vmem>>, %arg8: memref<1x32xf32, #tpu.memory_space<vmem>>, %arg9: memref<32x64xbf16, #tpu.memory_space<vmem>>, %arg10: memref<1x64xf32, #tpu.memory_space<vmem>>, %arg11: memref<64x32xbf16, #tpu.memory_space<vmem>>, %arg12: memref<1x32xf32, #tpu.memory_space<vmem>>, %arg13: memref<1x32xf32, #tpu.memory_space<vmem>>, %arg14: memref<1x32xf32, #tpu.memory_space<vmem>>, %arg15: memref<1x8x32xf32, #tpu.memory_space<vmem>>, %arg16: memref<8x32xbf16, #tpu.memory_space<vmem>>, %arg17: memref<8x32xbf16, #tpu.memory_space<vmem>>, %arg18: memref<8x32xbf16, #tpu.memory_space<vmem>>) attributes {dimension_semantics = [#tpu.dimension_semantics<parallel>, #tpu.dimension_semantics<arbitrary>], iteration_bounds = array<i64: 2, 1>, scalar_prefetch = 0 : i64, scratch_operands = 3 : i64, tpu.core_type = #tpu.core_type<tc>, window_params = [{transform_indices = @transform_0, window_bounds = array<i64: 1, 8, 32>}, {pipeline_mode = #tpu.pipeline_mode<synchronous>, transform_indices = @transform_1, window_bounds = array<i64: 32, 96>}, {pipeline_mode = #tpu.pipeline_mode<synchronous>, transform_indices = @transform_2, window_bounds = array<i64: 1, 96>}, {pipeline_mode = #tpu.pipeline_mode<synchronous>, transform_indices = @transform_3, window_bounds = array<i64: 32, 32>}, {pipeline_mode = #tpu.pipeline_mode<synchronous>, transform_indices = @transform_4, window_bounds = array<i64: 1, 32>}, {pipeline_mode = #tpu.pipeline_mode<synchronous>, transform_indices = @transform_5, window_bounds = array<i64: 1, 32>}, {pipeline_mode = #tpu.pipeline_mode<synchronous>, transform_indices = @transform_6, window_bounds = array<i64: 1, 32>}, {pipeline_mode = #tpu.pipeline_mode<synchronous>, transform_indices = @transform_7, window_bounds = array<i64: 32, 64>}, {pipeline_mode = #tpu.pipeline_mode<synchronous>, transform_indices = @transform_8, window_bounds = array<i64: 1, 64>}, {pipeline_mode = #tpu.pipeline_mode<synchronous>, transform_indices = @transform_9, window_bounds = array<i64: 64, 32>}, {pipeline_mode = #tpu.pipeline_mode<synchronous>, transform_indices = @transform_10, window_bounds = array<i64: 1, 32>}, {pipeline_mode = #tpu.pipeline_mode<synchronous>, transform_indices = @transform_11, window_bounds = array<i64: 1, 32>}, {pipeline_mode = #tpu.pipeline_mode<synchronous>, transform_indices = @transform_12, window_bounds = array<i64: 1, 32>}, {transform_indices = @transform_13, window_bounds = array<i64: 1, 8, 32>}]} {
    %c0_i32 = arith.constant 0 : i32
    %0 = arith.cmpi eq, %arg1, %c0_i32 : i32
    %1 = arith.extui %0 : i1 to i32
    %c0_i32_0 = arith.constant 0 : i32
    %2 = arith.cmpi ne, %1, %c0_i32_0 : i32
    scf.if %2 {
      %c0_66 = arith.constant 0 : index
      %c0_67 = arith.constant 0 : index
      %c0_68 = arith.constant 0 : index
      %167 = vector.load %arg2[%c0_66, %c0_67, %c0_68] : memref<1x8x32xf32, #tpu.memory_space<vmem>>, vector<1x8x32xf32>
      %168 = vector.shape_cast %167 : vector<1x8x32xf32> to vector<8x32xf32>
      %169 = arith.truncf %168 : vector<8x32xf32> to vector<8x32xbf16>
      %c0_69 = arith.constant 0 : index
      %c0_70 = arith.constant 0 : index
      %170 = vector.load %arg3[%c0_69, %c0_70] : memref<32x96xbf16, #tpu.memory_space<vmem>>, vector<32x96xbf16>
      %cst_71 = arith.constant dense<0.000000e+00> : vector<8x96xf32>
      %171 = tpu.matmul %169, %170, %cst_71 {dimension_numbers = #tpu.dot_dimension_numbers<[1], [0], [0], [1], [0, 0, 1, 1], [], []>} : vector<8x32xbf16>, vector<32x96xbf16>, vector<8x96xf32> -> vector<8x96xf32>
      %c0_72 = arith.constant 0 : index
      %c0_73 = arith.constant 0 : index
      %172 = vector.load %arg4[%c0_72, %c0_73] : memref<1x96xf32, #tpu.memory_space<vmem>>, vector<1x96xf32>
      %173 = vector.broadcast %172 : vector<1x96xf32> to vector<8x96xf32>
      %174 = arith.addf %171, %173 : vector<8x96xf32>
      %175 = arith.truncf %174 : vector<8x96xf32> to vector<8x96xbf16>
      %176 = vector.extract_strided_slice %175 {offsets = [0, 0], sizes = [8, 32], strides = [1, 1]} : vector<8x96xbf16> to vector<8x32xbf16>
      %c0_74 = arith.constant 0 : index
      %c0_75 = arith.constant 0 : index
      %177 = vector.load %arg16[%c0_74, %c0_75] : memref<8x32xbf16, #tpu.memory_space<vmem>>, vector<8x32xbf16>
      tpu.vector_store %arg16[%c0_74, %c0_75], %176 {strides = array<i32>} : memref<8x32xbf16, #tpu.memory_space<vmem>>, vector<8x32xbf16>,
      %178 = vector.extract_strided_slice %175 {offsets = [0, 32], sizes = [8, 32], strides = [1, 1]} : vector<8x96xbf16> to vector<8x32xbf16>
      %c0_76 = arith.constant 0 : index
      %c0_77 = arith.constant 0 : index
      %179 = vector.load %arg17[%c0_76, %c0_77] : memref<8x32xbf16, #tpu.memory_space<vmem>>, vector<8x32xbf16>
      tpu.vector_store %arg17[%c0_76, %c0_77], %178 {strides = array<i32>} : memref<8x32xbf16, #tpu.memory_space<vmem>>, vector<8x32xbf16>,
      %180 = vector.extract_strided_slice %175 {offsets = [0, 64], sizes = [8, 32], strides = [1, 1]} : vector<8x96xbf16> to vector<8x32xbf16>
      %c0_78 = arith.constant 0 : index
      %c0_79 = arith.constant 0 : index
      %181 = vector.load %arg18[%c0_78, %c0_79] : memref<8x32xbf16, #tpu.memory_space<vmem>>, vector<8x32xbf16>
      tpu.vector_store %arg18[%c0_78, %c0_79], %180 {strides = array<i32>} : memref<8x32xbf16, #tpu.memory_space<vmem>>, vector<8x32xbf16>,
    } else {
    }
    %c8_i32 = arith.constant 8 : i32
    %3 = arith.muli %arg1, %c8_i32 : i32
    %4 = tpu.assume_multiple %3, 8 : i32
    %c0 = arith.constant 0 : index
    %5 = arith.index_cast %4 : i32 to index
    %c0_1 = arith.constant 0 : index
    %6 = vector.load %arg2[%c0, %5, %c0_1] : memref<1x8x32xf32, #tpu.memory_space<vmem>>, vector<1x8x32xf32>
    %7 = vector.shape_cast %6 : vector<1x8x32xf32> to vector<8x32xf32>
    %8 = arith.index_cast %4 : i32 to index
    %c0_2 = arith.constant 0 : index
    %9 = vector.load %arg16[%8, %c0_2] : memref<8x32xbf16, #tpu.memory_space<vmem>>, vector<8x32xbf16>
    %c0_3 = arith.constant 0 : index
    %c0_4 = arith.constant 0 : index
    %10 = vector.load %arg17[%c0_3, %c0_4] : memref<8x32xbf16, #tpu.memory_space<vmem>>, vector<8x32xbf16>
    %c0_5 = arith.constant 0 : index
    %c0_6 = arith.constant 0 : index
    %11 = vector.load %arg18[%c0_5, %c0_6] : memref<8x32xbf16, #tpu.memory_space<vmem>>, vector<8x32xbf16>
    %cst = arith.constant 0.000000e+00 : f32
    %12 = vector.broadcast %cst : f32 to vector<8x32xf32>
    %13 = vector.extract_strided_slice %9 {offsets = [0, 0], sizes = [8, 8], strides = [1, 1]} : vector<8x32xbf16> to vector<8x8xbf16>
    %14 = vector.extract_strided_slice %10 {offsets = [0, 0], sizes = [8, 8], strides = [1, 1]} : vector<8x32xbf16> to vector<8x8xbf16>
    %15 = vector.extract_strided_slice %11 {offsets = [0, 0], sizes = [8, 8], strides = [1, 1]} : vector<8x32xbf16> to vector<8x8xbf16>
    %16 = tpu.transpose %14, [1, 0] : vector<8x8xbf16> -> vector<8x8xbf16>
    %cst_7 = arith.constant dense<0.000000e+00> : vector<8x8xf32>
    %17 = tpu.matmul %13, %16, %cst_7 {dimension_numbers = #tpu.dot_dimension_numbers<[1], [0], [0], [1], [0, 0, 1, 1], [], []>} : vector<8x8xbf16>, vector<8x8xbf16>, vector<8x8xf32> -> vector<8x8xf32>
    %cst_8 = arith.constant dense<0xFF800000> : vector<8xf32>
    %18 = vector.multi_reduction <maximumf>, %17, %cst_8 [1] : vector<8x8xf32> to vector<8xf32>
    %19 = vector.shape_cast %18 : vector<8xf32> to vector<8x1xf32>
    %20 = vector.broadcast %19 : vector<8x1xf32> to vector<8x8xf32>
    %21 = arith.subf %17, %20 : vector<8x8xf32>
    %22 = math.exp %21 : vector<8x8xf32>
    %cst_9 = arith.constant dense<0.000000e+00> : vector<8xf32>
    %23 = vector.multi_reduction <add>, %22, %cst_9 [1] : vector<8x8xf32> to vector<8xf32>
    %24 = vector.shape_cast %23 : vector<8xf32> to vector<8x1xf32>
    %25 = tpu.reciprocal %24 {approx = true} : vector<8x1xf32> -> vector<8x1xf32>
    %26 = vector.broadcast %25 : vector<8x1xf32> to vector<8x8xf32>
    %27 = arith.mulf %22, %26 : vector<8x8xf32>
    %28 = arith.truncf %27 : vector<8x8xf32> to vector<8x8xbf16>
    %cst_10 = arith.constant dense<0.000000e+00> : vector<8x8xf32>
    %29 = tpu.matmul %28, %15, %cst_10 {dimension_numbers = #tpu.dot_dimension_numbers<[1], [0], [0], [1], [0, 0, 1, 1], [], []>} : vector<8x8xbf16>, vector<8x8xbf16>, vector<8x8xf32> -> vector<8x8xf32>
    %30 = arith.truncf %29 : vector<8x8xf32> to vector<8x8xbf16>
    %c0_11 = arith.constant 0 : index
    %c0_12 = arith.constant 0 : index
    %31 = vector.load %arg5[%c0_11, %c0_12] : memref<32x32xbf16, #tpu.memory_space<vmem>>, vector<8x32xbf16>
    %cst_13 = arith.constant dense<0.000000e+00> : vector<8x32xf32>
    %32 = tpu.matmul %30, %31, %cst_13 {dimension_numbers = #tpu.dot_dimension_numbers<[1], [0], [0], [1], [0, 0, 1, 1], [], []>} : vector<8x8xbf16>, vector<8x32xbf16>, vector<8x32xf32> -> vector<8x32xf32>
    %33 = arith.addf %12, %32 : vector<8x32xf32>
    %34 = vector.extract_strided_slice %9 {offsets = [0, 8], sizes = [8, 8], strides = [1, 1]} : vector<8x32xbf16> to vector<8x8xbf16>
    %35 = vector.extract_strided_slice %10 {offsets = [0, 8], sizes = [8, 8], strides = [1, 1]} : vector<8x32xbf16> to vector<8x8xbf16>
    %36 = vector.extract_strided_slice %11 {offsets = [0, 8], sizes = [8, 8], strides = [1, 1]} : vector<8x32xbf16> to vector<8x8xbf16>
    %37 = tpu.transpose %35, [1, 0] : vector<8x8xbf16> -> vector<8x8xbf16>
    %cst_14 = arith.constant dense<0.000000e+00> : vector<8x8xf32>
    %38 = tpu.matmul %34, %37, %cst_14 {dimension_numbers = #tpu.dot_dimension_numbers<[1], [0], [0], [1], [0, 0, 1, 1], [], []>} : vector<8x8xbf16>, vector<8x8xbf16>, vector<8x8xf32> -> vector<8x8xf32>
    %cst_15 = arith.constant dense<0xFF800000> : vector<8xf32>
    %39 = vector.multi_reduction <maximumf>, %38, %cst_15 [1] : vector<8x8xf32> to vector<8xf32>
    %40 = vector.shape_cast %39 : vector<8xf32> to vector<8x1xf32>
    %41 = vector.broadcast %40 : vector<8x1xf32> to vector<8x8xf32>
    %42 = arith.subf %38, %41 : vector<8x8xf32>
    %43 = math.exp %42 : vector<8x8xf32>
    %cst_16 = arith.constant dense<0.000000e+00> : vector<8xf32>
    %44 = vector.multi_reduction <add>, %43, %cst_16 [1] : vector<8x8xf32> to vector<8xf32>
    %45 = vector.shape_cast %44 : vector<8xf32> to vector<8x1xf32>
    %46 = tpu.reciprocal %45 {approx = true} : vector<8x1xf32> -> vector<8x1xf32>
    %47 = vector.broadcast %46 : vector<8x1xf32> to vector<8x8xf32>
    %48 = arith.mulf %43, %47 : vector<8x8xf32>
    %49 = arith.truncf %48 : vector<8x8xf32> to vector<8x8xbf16>
    %cst_17 = arith.constant dense<0.000000e+00> : vector<8x8xf32>
    %50 = tpu.matmul %49, %36, %cst_17 {dimension_numbers = #tpu.dot_dimension_numbers<[1], [0], [0], [1], [0, 0, 1, 1], [], []>} : vector<8x8xbf16>, vector<8x8xbf16>, vector<8x8xf32> -> vector<8x8xf32>
    %51 = arith.truncf %50 : vector<8x8xf32> to vector<8x8xbf16>
    %c8 = arith.constant 8 : index
    %c0_18 = arith.constant 0 : index
    %52 = vector.load %arg5[%c8, %c0_18] : memref<32x32xbf16, #tpu.memory_space<vmem>>, vector<8x32xbf16>
    %cst_19 = arith.constant dense<0.000000e+00> : vector<8x32xf32>
    %53 = tpu.matmul %51, %52, %cst_19 {dimension_numbers = #tpu.dot_dimension_numbers<[1], [0], [0], [1], [0, 0, 1, 1], [], []>} : vector<8x8xbf16>, vector<8x32xbf16>, vector<8x32xf32> -> vector<8x32xf32>
    %54 = arith.addf %33, %53 : vector<8x32xf32>
    %55 = vector.extract_strided_slice %9 {offsets = [0, 16], sizes = [8, 8], strides = [1, 1]} : vector<8x32xbf16> to vector<8x8xbf16>
    %56 = vector.extract_strided_slice %10 {offsets = [0, 16], sizes = [8, 8], strides = [1, 1]} : vector<8x32xbf16> to vector<8x8xbf16>
    %57 = vector.extract_strided_slice %11 {offsets = [0, 16], sizes = [8, 8], strides = [1, 1]} : vector<8x32xbf16> to vector<8x8xbf16>
    %58 = tpu.transpose %56, [1, 0] : vector<8x8xbf16> -> vector<8x8xbf16>
    %cst_20 = arith.constant dense<0.000000e+00> : vector<8x8xf32>
    %59 = tpu.matmul %55, %58, %cst_20 {dimension_numbers = #tpu.dot_dimension_numbers<[1], [0], [0], [1], [0, 0, 1, 1], [], []>} : vector<8x8xbf16>, vector<8x8xbf16>, vector<8x8xf32> -> vector<8x8xf32>
    %cst_21 = arith.constant dense<0xFF800000> : vector<8xf32>
    %60 = vector.multi_reduction <maximumf>, %59, %cst_21 [1] : vector<8x8xf32> to vector<8xf32>
    %61 = vector.shape_cast %60 : vector<8xf32> to vector<8x1xf32>
    %62 = vector.broadcast %61 : vector<8x1xf32> to vector<8x8xf32>
    %63 = arith.subf %59, %62 : vector<8x8xf32>
    %64 = math.exp %63 : vector<8x8xf32>
    %cst_22 = arith.constant dense<0.000000e+00> : vector<8xf32>
    %65 = vector.multi_reduction <add>, %64, %cst_22 [1] : vector<8x8xf32> to vector<8xf32>
    %66 = vector.shape_cast %65 : vector<8xf32> to vector<8x1xf32>
    %67 = tpu.reciprocal %66 {approx = true} : vector<8x1xf32> -> vector<8x1xf32>
    %68 = vector.broadcast %67 : vector<8x1xf32> to vector<8x8xf32>
    %69 = arith.mulf %64, %68 : vector<8x8xf32>
    %70 = arith.truncf %69 : vector<8x8xf32> to vector<8x8xbf16>
    %cst_23 = arith.constant dense<0.000000e+00> : vector<8x8xf32>
    %71 = tpu.matmul %70, %57, %cst_23 {dimension_numbers = #tpu.dot_dimension_numbers<[1], [0], [0], [1], [0, 0, 1, 1], [], []>} : vector<8x8xbf16>, vector<8x8xbf16>, vector<8x8xf32> -> vector<8x8xf32>
    %72 = arith.truncf %71 : vector<8x8xf32> to vector<8x8xbf16>
    %c16 = arith.constant 16 : index
    %c0_24 = arith.constant 0 : index
    %73 = vector.load %arg5[%c16, %c0_24] : memref<32x32xbf16, #tpu.memory_space<vmem>>, vector<8x32xbf16>
    %cst_25 = arith.constant dense<0.000000e+00> : vector<8x32xf32>
    %74 = tpu.matmul %72, %73, %cst_25 {dimension_numbers = #tpu.dot_dimension_numbers<[1], [0], [0], [1], [0, 0, 1, 1], [], []>} : vector<8x8xbf16>, vector<8x32xbf16>, vector<8x32xf32> -> vector<8x32xf32>
    %75 = arith.addf %54, %74 : vector<8x32xf32>
    %76 = vector.extract_strided_slice %9 {offsets = [0, 24], sizes = [8, 8], strides = [1, 1]} : vector<8x32xbf16> to vector<8x8xbf16>
    %77 = vector.extract_strided_slice %10 {offsets = [0, 24], sizes = [8, 8], strides = [1, 1]} : vector<8x32xbf16> to vector<8x8xbf16>
    %78 = vector.extract_strided_slice %11 {offsets = [0, 24], sizes = [8, 8], strides = [1, 1]} : vector<8x32xbf16> to vector<8x8xbf16>
    %79 = tpu.transpose %77, [1, 0] : vector<8x8xbf16> -> vector<8x8xbf16>
    %cst_26 = arith.constant dense<0.000000e+00> : vector<8x8xf32>
    %80 = tpu.matmul %76, %79, %cst_26 {dimension_numbers = #tpu.dot_dimension_numbers<[1], [0], [0], [1], [0, 0, 1, 1], [], []>} : vector<8x8xbf16>, vector<8x8xbf16>, vector<8x8xf32> -> vector<8x8xf32>
    %cst_27 = arith.constant dense<0xFF800000> : vector<8xf32>
    %81 = vector.multi_reduction <maximumf>, %80, %cst_27 [1] : vector<8x8xf32> to vector<8xf32>
    %82 = vector.shape_cast %81 : vector<8xf32> to vector<8x1xf32>
    %83 = vector.broadcast %82 : vector<8x1xf32> to vector<8x8xf32>
    %84 = arith.subf %80, %83 : vector<8x8xf32>
    %85 = math.exp %84 : vector<8x8xf32>
    %cst_28 = arith.constant dense<0.000000e+00> : vector<8xf32>
    %86 = vector.multi_reduction <add>, %85, %cst_28 [1] : vector<8x8xf32> to vector<8xf32>
    %87 = vector.shape_cast %86 : vector<8xf32> to vector<8x1xf32>
    %88 = tpu.reciprocal %87 {approx = true} : vector<8x1xf32> -> vector<8x1xf32>
    %89 = vector.broadcast %88 : vector<8x1xf32> to vector<8x8xf32>
    %90 = arith.mulf %85, %89 : vector<8x8xf32>
    %91 = arith.truncf %90 : vector<8x8xf32> to vector<8x8xbf16>
    %cst_29 = arith.constant dense<0.000000e+00> : vector<8x8xf32>
    %92 = tpu.matmul %91, %78, %cst_29 {dimension_numbers = #tpu.dot_dimension_numbers<[1], [0], [0], [1], [0, 0, 1, 1], [], []>} : vector<8x8xbf16>, vector<8x8xbf16>, vector<8x8xf32> -> vector<8x8xf32>
    %93 = arith.truncf %92 : vector<8x8xf32> to vector<8x8xbf16>
    %c24 = arith.constant 24 : index
    %c0_30 = arith.constant 0 : index
    %94 = vector.load %arg5[%c24, %c0_30] : memref<32x32xbf16, #tpu.memory_space<vmem>>, vector<8x32xbf16>
    %cst_31 = arith.constant dense<0.000000e+00> : vector<8x32xf32>
    %95 = tpu.matmul %93, %94, %cst_31 {dimension_numbers = #tpu.dot_dimension_numbers<[1], [0], [0], [1], [0, 0, 1, 1], [], []>} : vector<8x8xbf16>, vector<8x32xbf16>, vector<8x32xf32> -> vector<8x32xf32>
    %96 = arith.addf %75, %95 : vector<8x32xf32>
    %c0_32 = arith.constant 0 : index
    %c0_33 = arith.constant 0 : index
    %97 = vector.load %arg6[%c0_32, %c0_33] : memref<1x32xf32, #tpu.memory_space<vmem>>, vector<1x32xf32>
    %98 = vector.broadcast %97 : vector<1x32xf32> to vector<8x32xf32>
    %99 = arith.addf %96, %98 : vector<8x32xf32>
    %100 = arith.addf %99, %7 : vector<8x32xf32>
    %cst_34 = arith.constant dense<0.000000e+00> : vector<8xf32>
    %101 = vector.multi_reduction <add>, %100, %cst_34 [1] : vector<8x32xf32> to vector<8xf32>
    %102 = vector.shape_cast %101 : vector<8xf32> to vector<8x1xf32>
    %cst_35 = arith.constant 3.200000e+01 : f32
    %103 = vector.broadcast %cst_35 : f32 to vector<8x1xf32>
    %104 = arith.divf %102, %103 : vector<8x1xf32>
    %105 = vector.broadcast %104 : vector<8x1xf32> to vector<8x32xf32>
    %106 = arith.subf %100, %105 : vector<8x32xf32>
    %107 = arith.mulf %106, %106 : vector<8x32xf32>
    %cst_36 = arith.constant dense<0.000000e+00> : vector<8xf32>
    %108 = vector.multi_reduction <add>, %107, %cst_36 [1] : vector<8x32xf32> to vector<8xf32>
    %109 = vector.shape_cast %108 : vector<8xf32> to vector<8x1xf32>
    %cst_37 = arith.constant 3.200000e+01 : f32
    %110 = vector.broadcast %cst_37 : f32 to vector<8x1xf32>
    %111 = arith.divf %109, %110 : vector<8x1xf32>
    %112 = vector.broadcast %104 : vector<8x1xf32> to vector<8x32xf32>
    %113 = arith.subf %100, %112 : vector<8x32xf32>
    %cst_38 = arith.constant 9.99999974E-6 : f32
    %114 = vector.broadcast %cst_38 : f32 to vector<8x1xf32>
    %115 = arith.addf %111, %114 : vector<8x1xf32>
    %116 = math.rsqrt %115 : vector<8x1xf32>
    %117 = vector.broadcast %116 : vector<8x1xf32> to vector<8x32xf32>
    %118 = arith.mulf %113, %117 : vector<8x32xf32>
    %c0_39 = arith.constant 0 : index
    %c0_40 = arith.constant 0 : index
    %119 = vector.load %arg7[%c0_39, %c0_40] : memref<1x32xf32, #tpu.memory_space<vmem>>, vector<1x32xf32>
    %120 = vector.broadcast %119 : vector<1x32xf32> to vector<8x32xf32>
    %121 = arith.mulf %118, %120 : vector<8x32xf32>
    %c0_41 = arith.constant 0 : index
    %c0_42 = arith.constant 0 : index
    %122 = vector.load %arg8[%c0_41, %c0_42] : memref<1x32xf32, #tpu.memory_space<vmem>>, vector<1x32xf32>
    %123 = vector.broadcast %122 : vector<1x32xf32> to vector<8x32xf32>
    %124 = arith.addf %121, %123 : vector<8x32xf32>
    %125 = arith.truncf %124 : vector<8x32xf32> to vector<8x32xbf16>
    %c0_43 = arith.constant 0 : index
    %c0_44 = arith.constant 0 : index
    %126 = vector.load %arg9[%c0_43, %c0_44] : memref<32x64xbf16, #tpu.memory_space<vmem>>, vector<32x64xbf16>
    %cst_45 = arith.constant dense<0.000000e+00> : vector<8x64xf32>
    %127 = tpu.matmul %125, %126, %cst_45 {dimension_numbers = #tpu.dot_dimension_numbers<[1], [0], [0], [1], [0, 0, 1, 1], [], []>} : vector<8x32xbf16>, vector<32x64xbf16>, vector<8x64xf32> -> vector<8x64xf32>
    %c0_46 = arith.constant 0 : index
    %c0_47 = arith.constant 0 : index
    %128 = vector.load %arg10[%c0_46, %c0_47] : memref<1x64xf32, #tpu.memory_space<vmem>>, vector<1x64xf32>
    %129 = vector.broadcast %128 : vector<1x64xf32> to vector<8x64xf32>
    %130 = arith.addf %127, %129 : vector<8x64xf32>
    %cst_48 = arith.constant 0.000000e+00 : f32
    %131 = vector.broadcast %cst_48 : f32 to vector<8x64xf32>
    %132 = arith.maximumf %130, %131 : vector<8x64xf32>
    %133 = arith.truncf %132 : vector<8x64xf32> to vector<8x64xbf16>
    %c0_49 = arith.constant 0 : index
    %c0_50 = arith.constant 0 : index
    %134 = vector.load %arg11[%c0_49, %c0_50] : memref<64x32xbf16, #tpu.memory_space<vmem>>, vector<64x32xbf16>
    %cst_51 = arith.constant dense<0.000000e+00> : vector<8x32xf32>
    %135 = tpu.matmul %133, %134, %cst_51 {dimension_numbers = #tpu.dot_dimension_numbers<[1], [0], [0], [1], [0, 0, 1, 1], [], []>} : vector<8x64xbf16>, vector<64x32xbf16>, vector<8x32xf32> -> vector<8x32xf32>
    %c0_52 = arith.constant 0 : index
    %c0_53 = arith.constant 0 : index
    %136 = vector.load %arg12[%c0_52, %c0_53] : memref<1x32xf32, #tpu.memory_space<vmem>>, vector<1x32xf32>
    %137 = vector.broadcast %136 : vector<1x32xf32> to vector<8x32xf32>
    %138 = arith.addf %135, %137 : vector<8x32xf32>
    %139 = arith.addf %138, %124 : vector<8x32xf32>
    %cst_54 = arith.constant dense<0.000000e+00> : vector<8xf32>
    %140 = vector.multi_reduction <add>, %139, %cst_54 [1] : vector<8x32xf32> to vector<8xf32>
    %141 = vector.shape_cast %140 : vector<8xf32> to vector<8x1xf32>
    %cst_55 = arith.constant 3.200000e+01 : f32
    %142 = vector.broadcast %cst_55 : f32 to vector<8x1xf32>
    %143 = arith.divf %141, %142 : vector<8x1xf32>
    %144 = vector.broadcast %143 : vector<8x1xf32> to vector<8x32xf32>
    %145 = arith.subf %139, %144 : vector<8x32xf32>
    %146 = arith.mulf %145, %145 : vector<8x32xf32>
    %cst_56 = arith.constant dense<0.000000e+00> : vector<8xf32>
    %147 = vector.multi_reduction <add>, %146, %cst_56 [1] : vector<8x32xf32> to vector<8xf32>
    %148 = vector.shape_cast %147 : vector<8xf32> to vector<8x1xf32>
    %cst_57 = arith.constant 3.200000e+01 : f32
    %149 = vector.broadcast %cst_57 : f32 to vector<8x1xf32>
    %150 = arith.divf %148, %149 : vector<8x1xf32>
    %151 = vector.broadcast %143 : vector<8x1xf32> to vector<8x32xf32>
    %152 = arith.subf %139, %151 : vector<8x32xf32>
    %cst_58 = arith.constant 9.99999974E-6 : f32
    %153 = vector.broadcast %cst_58 : f32 to vector<8x1xf32>
    %154 = arith.addf %150, %153 : vector<8x1xf32>
    %155 = math.rsqrt %154 : vector<8x1xf32>
    %156 = vector.broadcast %155 : vector<8x1xf32> to vector<8x32xf32>
    %157 = arith.mulf %152, %156 : vector<8x32xf32>
    %c0_59 = arith.constant 0 : index
    %c0_60 = arith.constant 0 : index
    %158 = vector.load %arg13[%c0_59, %c0_60] : memref<1x32xf32, #tpu.memory_space<vmem>>, vector<1x32xf32>
    %159 = vector.broadcast %158 : vector<1x32xf32> to vector<8x32xf32>
    %160 = arith.mulf %157, %159 : vector<8x32xf32>
    %c0_61 = arith.constant 0 : index
    %c0_62 = arith.constant 0 : index
    %161 = vector.load %arg14[%c0_61, %c0_62] : memref<1x32xf32, #tpu.memory_space<vmem>>, vector<1x32xf32>
    %162 = vector.broadcast %161 : vector<1x32xf32> to vector<8x32xf32>
    %163 = arith.addf %160, %162 : vector<8x32xf32>
    %c0_63 = arith.constant 0 : index
    %c0_64 = arith.constant 0 : index
    %c0_65 = arith.constant 0 : index
    %164 = vector.load %arg15[%c0_63, %c0_64, %c0_65] : memref<1x8x32xf32, #tpu.memory_space<vmem>>, vector<1x8x32xf32>
    %165 = vector.shape_cast %164 : vector<1x8x32xf32> to vector<8x32xf32>
    %166 = vector.shape_cast %163 : vector<8x32xf32> to vector<1x8x32xf32>
    tpu.vector_store %arg15[%c0_63, %c0_64, %c0_65], %166 {strides = array<i32>} : memref<1x8x32xf32, #tpu.memory_space<vmem>>, vector<1x8x32xf32>,
    return
  }
  func.func @transform_0(%arg0: i32, %arg1: i32) -> (i32, i32, i32) {
    %c0_i32 = arith.constant 0 : i32
    %c0_i32_0 = arith.constant 0 : i32
    %c0_i32_1 = arith.constant 0 : i32
    return %arg0, %c0_i32, %c0_i32_0 : i32, i32, i32
  }
  func.func @transform_1(%arg0: i32, %arg1: i32) -> (i32, i32) {
    %c0_i32 = arith.constant 0 : i32
    %c0_i32_0 = arith.constant 0 : i32
    %c0_i32_1 = arith.constant 0 : i32
    return %c0_i32, %c0_i32_0 : i32, i32
  }
  func.func @transform_2(%arg0: i32, %arg1: i32) -> (i32, i32) {
    %c0_i32 = arith.constant 0 : i32
    %c0_i32_0 = arith.constant 0 : i32
    %c0_i32_1 = arith.constant 0 : i32
    return %c0_i32, %c0_i32_0 : i32, i32
  }
  func.func @transform_3(%arg0: i32, %arg1: i32) -> (i32, i32) {
    %c0_i32 = arith.constant 0 : i32
    %c0_i32_0 = arith.constant 0 : i32
    %c0_i32_1 = arith.constant 0 : i32
    return %c0_i32, %c0_i32_0 : i32, i32
  }
  func.func @transform_4(%arg0: i32, %arg1: i32) -> (i32, i32) {
    %c0_i32 = arith.constant 0 : i32
    %c0_i32_0 = arith.constant 0 : i32
    %c0_i32_1 = arith.constant 0 : i32
    return %c0_i32, %c0_i32_0 : i32, i32
  }
  func.func @transform_5(%arg0: i32, %arg1: i32) -> (i32, i32) {
    %c0_i32 = arith.constant 0 : i32
    %c0_i32_0 = arith.constant 0 : i32
    %c0_i32_1 = arith.constant 0 : i32
    return %c0_i32, %c0_i32_0 : i32, i32
  }
  func.func @transform_6(%arg0: i32, %arg1: i32) -> (i32, i32) {
    %c0_i32 = arith.constant 0 : i32
    %c0_i32_0 = arith.constant 0 : i32
    %c0_i32_1 = arith.constant 0 : i32
    return %c0_i32, %c0_i32_0 : i32, i32
  }
  func.func @transform_7(%arg0: i32, %arg1: i32) -> (i32, i32) {
    %c0_i32 = arith.constant 0 : i32
    %c0_i32_0 = arith.constant 0 : i32
    %c0_i32_1 = arith.constant 0 : i32
    return %c0_i32, %c0_i32_0 : i32, i32
  }
  func.func @transform_8(%arg0: i32, %arg1: i32) -> (i32, i32) {
    %c0_i32 = arith.constant 0 : i32
    %c0_i32_0 = arith.constant 0 : i32
    %c0_i32_1 = arith.constant 0 : i32
    return %c0_i32, %c0_i32_0 : i32, i32
  }
  func.func @transform_9(%arg0: i32, %arg1: i32) -> (i32, i32) {
    %c0_i32 = arith.constant 0 : i32
    %c0_i32_0 = arith.constant 0 : i32
    %c0_i32_1 = arith.constant 0 : i32
    return %c0_i32, %c0_i32_0 : i32, i32
  }
  func.func @transform_10(%arg0: i32, %arg1: i32) -> (i32, i32) {
    %c0_i32 = arith.constant 0 : i32
    %c0_i32_0 = arith.constant 0 : i32
    %c0_i32_1 = arith.constant 0 : i32
    return %c0_i32, %c0_i32_0 : i32, i32
  }
  func.func @transform_11(%arg0: i32, %arg1: i32) -> (i32, i32) {
    %c0_i32 = arith.constant 0 : i32
    %c0_i32_0 = arith.constant 0 : i32
    %c0_i32_1 = arith.constant 0 : i32
    return %c0_i32, %c0_i32_0 : i32, i32
  }
  func.func @transform_12(%arg0: i32, %arg1: i32) -> (i32, i32) {
    %c0_i32 = arith.constant 0 : i32
    %c0_i32_0 = arith.constant 0 : i32
    %c0_i32_1 = arith.constant 0 : i32
    return %c0_i32, %c0_i32_0 : i32, i32
  }
  func.func @transform_13(%arg0: i32, %arg1: i32) -> (i32, i32, i32) {
    %c0_i32 = arith.constant 0 : i32
    %c0_i32_0 = arith.constant 0 : i32
    return %arg0, %arg1, %c0_i32 : i32, i32, i32
  }
}

</mosaic_0001>

<bundles_post_ra>
// kernel: tpu_custom_call.1
= control target key start
LH: loop header
LB: loop body
LE: loop exit
PB: predicated region body
PF: predicated region fallthrough
CT: control target
= control target key end

     0   :  { %18 = vsyncpa [#allocation6], 0  ;;  %s2335_s0 = inlined_call_operand.vmem [shape: f32[2,8,32], index: 0, kind: input, shape index: {}]   ;;  %s2336_s1 = inlined_call_operand.vmem [shape: bf16[32,96], index: 1, kind: input, shape index: {}]   ;;  %s2337_s2 = inlined_call_operand.vmem [shape: f32[1,96], index: 2, kind: input, shape index: {}]   ;;  %s2338_s3 = inlined_call_operand.vmem [shape: bf16[32,32], index: 3, kind: input, shape index: {}]   ;;  %s2339_s4 = inlined_call_operand.vmem [shape: f32[1,32], index: 4, kind: input, shape index: {}]   ;;  %s2340_s5 = inlined_call_operand.vmem [shape: f32[1,32], index: 5, kind: input, shape index: {}]   ;;  %s2341_s6 = inlined_call_operand.vmem [shape: f32[1,32], index: 6, kind: input, shape index: {}]   ;;  %s2342_s7 = inlined_call_operand.hbm [shape: bf16[32,64], index: 7, kind: input, shape index: {}]   ;;  %s2343_s8 = inlined_call_operand.vmem [shape: f32[1,64], index: 8, kind: input, shape index: {}]   ;;  %s2344_s9 = inlined_call_operand.vmem [shape: bf16[64,32], index: 9, kind: input, shape index: {}]   ;;  %s2345_s10 = inlined_call_operand.vmem [shape: f32[1,32], index: 10, kind: input, shape index: {}]   ;;  %s2346_s11 = inlined_call_operand.vmem [shape: f32[1,32], index: 11, kind: input, shape index: {}]   ;;  %s2347_s12 = inlined_call_operand.vmem [shape: f32[1,32], index: 12, kind: input, shape index: {}]   ;;  %s2348_s13 = inlined_call_operand.hbm [shape: f32[2,8,32], index: 13, kind: output, shape index: {}]  }
   0x1   :  { %19 = vsyncpa [#allocation7], 0 }
   0x2   :  { %21 = vsyncpa [#allocation7 + $0x1], 0  ;;  %s2007_s25 = smov 0   ;;  %s2009_s26 = smov 0  }
   0x3   :  { %s2011_s27 = smov 0   ;;  %s2013_s28 = smov 0  }
   0x4   :  { %s2015_s29 = smov 0   ;;  %s2017_s30 = smov 0  }
   0x5 LB: > { %2357 = sst [smem:[#allocation11_spill]] %s1912_s27  ;;  %s1524_s14 = sadd.s32 4294967295, %s1924_s30   ;;  %s1924_s30 = sphi %s2017_s30, %s27_s30   ;;  %s1920_s29 = sphi %s2015_s29, %s2375_s29   ;;  %s1916_s28 = sphi %s2013_s28, %s2374_s28   ;;  %s1912_s27 = sphi %s2011_s27, %s2373_s27   ;;  %s1908_s26 = sphi %s2009_s26, %s2377_s26   ;;  %s1904_s25 = sphi %s2007_s25, %s2376_s25  }
   0x6   : > { %2358 = sst [smem:[#allocation12_spill]] %s1920_s29  ;;  %s1525_s15 = sadd.s32 4294967294, %s1924_s30  }
   0x7   : > { %s39_s16 = sadd.s32 1, %s1920_s29  ;;  %s326_s17 = sadd.s32 1, %s1912_s27 }
   0x8   : > { %p41_p0 = scmp.ge.s32.totalorder %s39_s16, 2  ;;  %p336_p1 = scmp.ne.s32.totalorder %s1912_s27, %s1908_s26 }
   0x9   : > { %p337_p2 = scmp.eq.s32.totalorder %s1524_s14, 1  ;;  %p342_p3 = scmp.ne.s32.totalorder %s1908_s26, %s1904_s25 }
   0xa   : > { %s2379_s16 = smov (%p41_p0, %s39_s16), 0  ;;  %p343_p5 = scmp.eq.s32.totalorder %s1525_s15, 1 }
   0xb   : > { %2359 = sst [smem:[#allocation13_spill]] %s2379_s16  ;;  %p2047_p4 = por %p337_p2, %p336_p1 }
   0xc   : > { %s321_s19 = ssub.s32 %s1920_s29, %s2379_s16  ;;  %p1526_p6 = scmp.ge.s32.totalorder %s1924_s30, 1 }
   0xd   : > { %s2360_s18 = scalar_select %p2047_p4, 1, 0 }
   0xe   : > { %p324_p7 = scmp.eq.s32.totalorder %s321_s19, 0  ;;  %p2054_p8 = por %p343_p5, %p342_p3 }
   0xf   : > { %p350_p9 = scmp.lt.s32.totalorder %s1924_s30, 3  ;;  %p2066_p11 = scmp.eq.s32.totalorder %s1524_s14, 0 }
  0x10   : > { %s2361_s20 = scalar_select %p2054_p8, 1, 0 }
  0x11   : > { %s2060_s21 = scalar_select %p324_p7, %s1912_s27, %s326_s17  }
  0x12   : > { %2362 = sst [smem:[#allocation14_spill]] %s2361_s20  ;;  %p2062_p10 = pnand %p1526_p6, %p350_p9 }
  0x13   : > { %2363 = sst [smem:[#allocation15_spill]] %s2060_s21  ;;  %s1926_s24 = smov [#allocation5]  }
  0x14   : > { %s2364_s22 = scalar_select %p2062_p10, 1, 0 }
  0x15   : > { %s2365_s23 = scalar_select %p2066_p11, 1, 0 }
  0x16   : > { %p1714_p12 = pneg %p2062_p10  ;;  %s380_s15 = sshll.u32 %s1926_s24, 4  ;;  %s381_s15 = int_to_ptr.vmem [resolvable:$true] %s380_s15 }
  0x17   : > { %s1814_s29 = scalar_lea.hbm %s2342_s7, 256 }
  0x18   : > { %p2074_p13 = pnand %p2066_p11, %p1714_p12  ;;  %p1815_p0 = scmp.ne.s32.totalorder %s2342_s7, %s1814_s29 }
  0x19   : > { %p1821_p5 = scmp.lt.u32.totalorder %s1814_s29, %s2342_s7 }
  0x1a   : > { %p1816_p1 = pneg %p2074_p13 }
  0x1c   : > { %p1817_p2 = pnand %p1816_p1, %p1815_p0 }
  0x1e   : > { %p1818_p3 = pneg %p1817_p2 }
  0x20   : > { %p1823_p6 = pnand %p1821_p5, %p1818_p3 }
  0x22   : > { %1826 = shalt.err (!%p1823_p6)
}
  0x23   : > { %s1827_s20 = scalar_lea.vmem %s381_s15, 256  ;;  %p1835_p8 = scmp.lt.s32.totalorder %s381_s15, %s381_s15 }
  0x24   : > { %p1828_p7 = scmp.ne.s32.totalorder %s381_s15, %s1827_s20  ;;  %p1836_p4 = scmp.lt.s32.totalorder %s1827_s20, %s1827_s20 }
  0x26   : > { %p1830_p9 = pnand %p1828_p7, %p1816_p1  ;;  %p1837_p11 = por %p1836_p4, %p1835_p8 }
  0x28   : > { %p1831_p12 = pneg %p1830_p9 }
  0x2a   : > { %p1838_p10 = pnand %p1837_p11, %p1831_p12 }
  0x2c   : > { %1841 = shalt.err (!%p1838_p10)
}
  0x2d   : > { %s1927_s16 = smov 64   ;;  %s1928_s21 = smov 4  }
  0x2e   : > { %1717 = dma.hbm_to_vmem [thread:$0]  (!%p2074_p13), %s2342_s7, 256, %s381_s15, [#allocation6], %s1927_s16, %s1927_s16, %s1928_s21  }
  0x2f   : > { %p2367_p0 = scmp.ne.s32.totalorder %s2364_s22, 0 }
  0x30   : > { %p2368_p2 = scmp.ne.s32.totalorder (!%p2367_p0), %s2365_s23, 0 }
  0x31   : > { %418 = sbr.rel (%p2367_p0) target bundleno = 3853 (0xf0d), region = 72 }
  0x38   : > { %1895 = dma.done.wait (%p2368_p2), [#allocation6], 256  }
  0x39   : > { %1897 = vsyncadd (%p2368_p2), [#allocation6], 4294967040  ;;  %p461_p4 = scmp.lt.s32.totalorder %s1916_s28, 1  ;;  %v1929_v0 = vmov 0.0   ;;  %vm1930_vm0 = vmmov 0   ;;  %v1783_v1 = vld [vmem:[%s2336_s1] sm:$0xff]  }
  0x3a   : > { %1608 = vmatprep.subr.bf16.mxu1 %v1929_v0  ;;  %1612 = vmatprep.mubr.msk.bf16.mxu1 %vm1930_vm0, %v1929_v0  ;;  %v1784_v2 = vld [vmem:[%s2336_s1 + $0x8] sm:$0xff]   ;;  %vm495_vm1 = vcmask 261120   ;;  %v1533_v5 = vld [vmem:[%s2337_s2] ss:$0 sm:$0xff]  ;;  %vm540_vm2 = vcmask 257024   ;;  %s1931_s14 = smov 96  }
  0x3b   : > { %s462_s27 = scalar_select %p461_p4, %s1916_s28, 1  ;;  %1622 = vmatprep.subr.bf16.mxu0 %v1929_v0  ;;  %1624 = vmatprep.mubr.msk.bf16.mxu0 %vm1930_vm0, %v1929_v0  ;;  %vm563_vm3 = vcmask 64512   ;;  %vm625_vm4 = vcmask 1043456   ;;  %v791_v49 = vld [vmem:[%s2338_s3 + $0x4] sm:$0xf]  ;;  %vm1350_vm5 = vcmask 523264  }
  0x3c   : > { %1609 = vmatpush3.bf16.msra.mxu1 %v1783_v1  ;;  %s1934_s20 = smov 112   ;;  %v796_v50 = vsel %vm625_vm4, %v791_v49, 0  ;;  %v670_v55 = vld [vmem:[%s2338_s3] sm:$0xf]  ;;  %s1935_s24 = smov 104  }
  0x3d   : > { %s1532_s29 = sshll.u32 %s462_s27, 3  ;;  %1610 = vmatprep.subr.bf16.mxu1 %v1929_v0  ;;  %s1932_s27 = smov 120   ;;  %v842_v58 = vsel %vm625_vm4, %v670_v55, 0 }
  0x3e   : > { %s464_s23 = scalar_lea.vmem %s2335_s0, %s1532_s29  ;;  %s1933_s29 = smov 64  }
  0x3f   : > { %v2117_v3 = vld [vmem:[%s464_s23] sm:$0xff]  ;;  %s458_s19 = sand.u32 1, %s1908_s26   ;;  %p2369_p10 = scmp.ne.s32.totalorder %s2360_s18, 0 }
  0x40   : > { %v471_v4 = vpack.c.bf16 %v2117_v3, %v2117_v3  ;;  %1611 = vmatpush3.bf16.msra.mxu1 %v1784_v2  ;;  %s1426_s16 = scalar_lea.sflag [#allocation7], %s458_s19 }
  0x41   : > { %1616 = vmatprep.subr.bf16.mxu1 %v1929_v0 }
  0x43   : > { %1613 = vmatmul.mubr.msk.bf16.vlgmr.msra.gmra.mrb[0].mxu1 %vm495_vm1, %v471_v4 }
  0x44   : > { %1618 = vmatprep.mubr.msk.bf16.mxu1 %vm1930_vm0, %v1929_v0 }
 0x116   : > { %v533_v6 = vpop.f32.mrb[0].mxu1 }
 0x117   : > { %v534_v7 = vadd.f32 %v1533_v5, %v533_v6  ;;  %v1614_v8 = vpop.f32.mrb[1].mxu1 }
 0x118   : > { %v536_v9 = vpop.f32.mrb[2].mxu1 }
 0x119   : > { %v539_v10 = vpack.c.bf16 %v534_v7, %v534_v7  ;;  %v1615_v11 = vpop.f32.mrb[3].mxu1 }
 0x11b   : > { %541 = vst.msk [vmem:[#allocation2] sm:$0xf] %vm540_vm2, %v539_v10  ;;  %545 = vrot.lane.b32.xlu0 %v539_v10, %s1931_s14 }
 0x122   : > { %v560_v12 = vld [vmem:[#allocation2] sm:$0xf] }
 0x123   : > { %v2130_v13 = vcombine.low %v560_v12, %v560_v12 }
 0x125   : > { %674 = vrot.lane.b32.xlu1 %v2130_v13, %s1932_s27 }
 0x18d   : > { %v546_v14 = vpop.permute.xlu0 %545 }
 0x18e   : > { %548 = vst.msk [vmem:[#allocation3] sm:$0xf] %vm540_vm2, %v546_v14 }
 0x195   : > { %v561_v15 = vld [vmem:[#allocation3] sm:$0xf] }
 0x196   : > { %v568_v16 = vsel %vm563_vm3, %v561_v15, 0  ;;  %v2136_v17 = vcombine.low %v561_v15, %v561_v15 }
 0x197   : > { %1617 = vmatpush3.bf16.xpose.msra.mxu1 %v568_v16  ;;  %v675_v20 = vpop.permute.xlu1 %674 }
 0x198   : > { %679 = vrot.lane.b32.xlu0 %v2136_v17, %s1932_s27  ;;  %1628 = vmatprep.subr.bf16.mxu1 %v1929_v0 }
 0x19e   : > { %1619 = vmatmul.mubr.msk.bf16.vlgmr.msra.gmra.mrb[4].mxu1 %vm563_vm3, %v560_v12 }
 0x19f   : > { %1630 = vmatprep.mubr.msk.bf16.mxu1 %vm1930_vm0, %v1929_v0 }
 0x20a   : > { %v680_v18 = vpop.permute.xlu0 %679 }
 0x20b   : > { %v685_v19 = vsel %vm563_vm3, %v680_v18, 0 }
 0x20c   : > { %1629 = vmatpush3.bf16.xpose.msra.mxu1 %v685_v19 }
 0x20d   : > { %1640 = vmatprep.subr.bf16.mxu1 %v1929_v0 }
 0x213   : > { %1631 = vmatmul.mubr.msk.bf16.vlgmr.msra.gmra.mrb[8].mxu1 %vm563_vm3, %v675_v20 }
 0x214   : > { %1642 = vmatprep.mubr.msk.bf16.mxu1 %vm1930_vm0, %v1929_v0  ;;  %1641 = vmatpush3.bf16.msra.mxu1 %v796_v50 }
 0x215   : > { %1652 = vmatprep.subr.bf16.mxu1 %v1929_v0 }
 0x271   : > { %v604_v21 = vpop.f32.mrb[4].mxu1 }
 0x272   : > { %v1620_v22 = vpop.f32.mrb[5].mxu1  ;;  %v610_v23 = vsel %vm563_vm3, %v604_v21, -inf }
 0x273   : > { %611 = vmax.xlane.f32.xlu1 %v610_v23  ;;  %v607_v24 = vpop.f32.mrb[6].mxu1 }
 0x274   : > { %v1621_v25 = vpop.f32.mrb[7].mxu1 }
 0x2e6   : > { %v721_v26 = vpop.f32.mrb[8].mxu1 }
 0x2e7   : > { %v1632_v27 = vpop.f32.mrb[9].mxu1  ;;  %v727_v28 = vsel %vm563_vm3, %v721_v26, -inf }
 0x2e8   : > { %728 = vmax.xlane.f32.xlu0 %v727_v28  ;;  %v724_v29 = vpop.f32.mrb[10].mxu1 }
 0x2e9   : > { %v1633_v30 = vpop.f32.mrb[11].mxu1 }
 0x2fe   : > { %549 = vrot.lane.b32.xlu0 %v539_v10, %s1933_s29 }
 0x300   : > { %v612_v31 = vpop.xlane.xlu1 %611 }
 0x301   : > { %v613_v32 = vsub.f32 %v604_v21, %v612_v31 }
 0x302   : > { %886 = vrot.lane.b32.xlu0 %v2136_v17, %s1934_s20 }
 0x303   : > { %v614_v33 = vmul.f32 1.442695, %v613_v32 }
 0x305   : > { %1794 = vpow2.f32 %v614_v33 }
 0x306   : > { %884 = vrot.lane.b32.xlu0 %v2130_v13, %s1934_s20 }
 0x30f   : > { %v1795_v34 = vpop.eup %1794 }
 0x310   : > { %v616_v35 = vsel %vm563_vm3, %v1795_v34, 0.0 }
 0x311   : > { %617 = vadd.xlane.f32.xlu1 %v616_v35 }
 0x375   : > { %v729_v36 = vpop.xlane.xlu0 %728 }
 0x376   : > { %v730_v37 = vsub.f32 %v721_v26, %v729_v36 }
 0x378   : > { %v731_v38 = vmul.f32 1.442695, %v730_v37 }
 0x379   : > { %v550_v39 = vpop.permute.xlu0 %549 }
 0x37a   : > { %1796 = vpow2.f32 %v731_v38  ;;  %552 = vst.msk [vmem:[#allocation4] sm:$0xf] %vm540_vm2, %v550_v39  ;;  %v995_v38 = vld [vmem:[%s2338_s3 + $0x8] sm:$0xf] }
 0x37b   : > { %v1000_v39 = vsel %vm625_vm4, %v995_v38, 0  ;;  %v1792_v38 = vld [vmem:[%s2344_s9 + $0x10] sm:$0xff]  }
 0x37d   : > { %v887_v1 = vpop.permute.xlu0 %886 }
 0x37e   : > { %v892_v7 = vsel %vm563_vm3, %v887_v1, 0 }
 0x381   : > { %v562_v40 = vld [vmem:[#allocation4] sm:$0xf]  ;;  %v885_v9 = vpop.permute.xlu0 %884 }
 0x382   : > { %v627_v41 = vsel %vm625_vm4, %v562_v40, 0  ;;  %v2160_v44 = vcombine.low %v562_v40, %v562_v40 }
 0x383   : > { %1623 = vmatpush3.bf16.msra.mxu0 %v627_v41 }
 0x384   : > { %v1797_v42 = vpop.eup %1796  ;;  %1634 = vmatprep.subr.bf16.mxu0 %v1929_v0 }
 0x385   : > { %v733_v43 = vsel %vm563_vm3, %v1797_v42, 0.0 }
 0x386   : > { %734 = vadd.xlane.f32.xlu1 %v733_v43 }
 0x397   : > { %742 = vrot.lane.b32.xlu1 %v2160_v44, %s1932_s27  ;;  %s1569_s27 = sshll.u32 %s1916_s28, 7  ;;  %s1936_s28 = smov [#allocation8]  }
 0x398   : > { %s2287_s15 = scalar_lea.hbm %s2348_s13, %s1569_s27 }
 0x39e   : > { %v618_v45 = vpop.xlane.xlu1 %617 }
 0x39f   : > { %1798 = vrcp.f32 %v618_v45 }
 0x3a9   : > { %v1799_v46 = vpop.eup %1798 }
 0x3aa   : > { %v620_v47 = vmul.f32 %v1799_v46, %v1795_v34 }
 0x3ac   : > { %v621_v48 = vpack.c.bf16 %v620_v47, %v620_v47 }
 0x3ae   : > { %1625 = vmatmul.mubr.msk.bf16.vlgmr.msra.gmra.mrb[0].mxu0 %vm563_vm3, %v621_v48 }
 0x3af   : > { %1636 = vmatprep.mubr.msk.bf16.mxu0 %vm1930_vm0, %v1929_v0 }
 0x413   : > { %v735_v51 = vpop.xlane.xlu1 %734 }
 0x414   : > { %1800 = vrcp.f32 %v735_v51 }
 0x417   : > { %v743_v52 = vpop.permute.xlu1 %742 }
 0x418   : > { %v748_v53 = vsel %vm625_vm4, %v743_v52, 0 }
 0x419   : > { %1635 = vmatpush3.bf16.msra.mxu0 %v748_v53 }
 0x41a   : > { %1646 = vmatprep.subr.bf16.mxu0 %v1929_v0 }
 0x41e   : > { %v1801_v54 = vpop.eup %1800 }
 0x41f   : > { %v737_v56 = vmul.f32 %v1801_v54, %v1797_v42 }
 0x421   : > { %v738_v57 = vpack.c.bf16 %v737_v56, %v737_v56 }
 0x423   : > { %1637 = vmatmul.mubr.msk.bf16.vlgmr.msra.gmra.mrb[4].mxu0 %vm563_vm3, %v738_v57 }
 0x424   : > { %1647 = vmatpush3.bf16.msra.mxu0 %v842_v58  ;;  %1648 = vmatprep.mubr.msk.bf16.mxu0 %vm1930_vm0, %v1929_v0  ;;  %v1154_v58 = vld [vmem:[%s2338_s3 + $0xc] sm:$0xf] }
 0x425   : > { %1658 = vmatprep.subr.bf16.mxu0 %v1929_v0 }
 0x481   : > { %v663_v59 = vpop.f32.mrb[0].mxu0 }
 0x482   : > { %v669_v60 = vpack.c.bf16 %v663_v59, %v663_v59  ;;  %v1626_v61 = vpop.f32.mrb[1].mxu0 }
 0x483   : > { %v666_v62 = vpop.f32.mrb[2].mxu0 }
 0x484   : > { %v1627_v63 = vpop.f32.mrb[3].mxu0  ;;  %1649 = vmatmul.mubr.msk.bf16.vlgmr.msra.gmra.mrb[8].mxu0 %vm563_vm3, %v669_v60 }
 0x485   : > { %1660 = vmatprep.mubr.msk.bf16.mxu0 %vm1930_vm0, %v1929_v0 }
 0x4f6   : > { %v784_v2 = vpop.f32.mrb[4].mxu0 }
 0x4f7   : > { %v790_v4 = vpack.c.bf16 %v784_v2, %v784_v2  ;;  %v1638_v5 = vpop.f32.mrb[5].mxu0 }
 0x4f8   : > { %v787_v6 = vpop.f32.mrb[6].mxu0 }
 0x4f9   : > { %v1639_v8 = vpop.f32.mrb[7].mxu0  ;;  %1643 = vmatmul.mubr.msk.bf16.vlgmr.msra.gmra.mrb[12].mxu1 %vm563_vm3, %v790_v4 }
 0x4fa   : > { %1653 = vmatpush3.bf16.xpose.msra.mxu1 %v892_v7  ;;  %1654 = vmatprep.mubr.msk.bf16.mxu1 %vm1930_vm0, %v1929_v0 }
 0x4fb   : > { %1664 = vmatprep.subr.bf16.mxu1 %v1929_v0 }
 0x501   : > { %1655 = vmatmul.mubr.msk.bf16.vlgmr.msra.gmra.mrb[16].mxu1 %vm563_vm3, %v885_v9 }
 0x502   : > { %1666 = vmatprep.mubr.msk.bf16.mxu1 %vm1930_vm0, %v1929_v0  ;;  %1665 = vmatpush3.bf16.msra.mxu1 %v1000_v39  ;;  %v1793_v39 = vld [vmem:[%s2344_s9 + $0x18] sm:$0xff]  }
 0x503   : > { %1676 = vmatprep.subr.bf16.mxu1 %v1929_v0 }
 0x557   : > { %v878_v10 = vpop.f32.mrb[8].mxu0 }
 0x558   : > { %v1650_v11 = vpop.f32.mrb[9].mxu0 }
 0x559   : > { %v881_v12 = vpop.f32.mrb[10].mxu0 }
 0x55a   : > { %v1651_v14 = vpop.f32.mrb[11].mxu0  ;;  %v1553_v12 = vld [vmem:[%s2339_s4] ss:$0 sm:$0xff] }
 0x5cc   : > { %v832_v15 = vpop.f32.mrb[12].mxu1 }
 0x5cd   : > { %v2193_v16 = vadd.f32 %v878_v10, %v832_v15  ;;  %v1644_v18 = vpop.f32.mrb[13].mxu1 }
 0x5ce   : > { %v835_v19 = vpop.f32.mrb[14].mxu1 }
 0x5cf   : > { %v1645_v20 = vpop.f32.mrb[15].mxu1 }
 0x5d4   : > { %v928_v21 = vpop.f32.mrb[16].mxu1 }
 0x5d5   : > { %v1656_v22 = vpop.f32.mrb[17].mxu1  ;;  %v934_v23 = vsel %vm563_vm3, %v928_v21, -inf }
 0x5d6   : > { %935 = vmax.xlane.f32.xlu1 %v934_v23  ;;  %v931_v24 = vpop.f32.mrb[18].mxu1 }
 0x5d7   : > { %v1657_v25 = vpop.f32.mrb[19].mxu1 }
 0x5e7   : > { %1045 = vrot.lane.b32.xlu1 %v2136_v17, %s1935_s24 }
 0x5eb   : > { %1043 = vrot.lane.b32.xlu1 %v2130_v13, %s1935_s24 }
 0x663   : > { %v936_v26 = vpop.xlane.xlu1 %935 }
 0x664   : > { %v937_v27 = vsub.f32 %v928_v21, %v936_v26 }
 0x666   : > { %v938_v28 = vmul.f32 1.442695, %v937_v27  ;;  %v1788_v27 = vld [vmem:[#allocation5] sm:$0xff]  }
 0x667   : > { %v1046_v34 = vpop.permute.xlu1 %1045 }
 0x668   : > { %1802 = vpow2.f32 %v938_v28  ;;  %v1051_v36 = vsel %vm563_vm3, %v1046_v34, 0  ;;  %v1789_v28 = vld [vmem:[#allocation5 + $0x8] sm:$0xff]   ;;  %v1555_v34 = vld [vmem:[%s2341_s6] ss:$0 sm:$0xff] }
 0x66b   : > { %v1044_v37 = vpop.permute.xlu1 %1043 }
 0x672   : > { %v1803_v29 = vpop.eup %1802 }
 0x673   : > { %v940_v30 = vsel %vm563_vm3, %v1803_v29, 0.0 }
 0x674   : > { %941 = vadd.xlane.f32.xlu0 %v940_v30 }
 0x68a   : > { %946 = vrot.lane.b32.xlu0 %v2160_v44, %s1934_s20 }
 0x701   : > { %v942_v31 = vpop.xlane.xlu0 %941 }
 0x702   : > { %1804 = vrcp.f32 %v942_v31 }
 0x705   : > { %v947_v32 = vpop.permute.xlu0 %946 }
 0x706   : > { %v952_v33 = vsel %vm625_vm4, %v947_v32, 0 }
 0x707   : > { %1659 = vmatpush3.bf16.msra.mxu0 %v952_v33 }
 0x708   : > { %1670 = vmatprep.subr.bf16.mxu0 %v1929_v0 }
 0x70c   : > { %v1805_v13 = vpop.eup %1804 }
 0x70d   : > { %v944_v17 = vmul.f32 %v1805_v13, %v1803_v29  ;;  %v1791_v29 = vld [vmem:[%s2344_s9 + $0x8] sm:$0xff]   ;;  %v1554_v13 = vld [vmem:[%s2340_s5] ss:$0 sm:$0xff] }
 0x70f   : > { %v945_v35 = vpack.c.bf16 %v944_v17, %v944_v17 }
 0x711   : > { %1661 = vmatmul.mubr.msk.bf16.vlgmr.msra.gmra.mrb[12].mxu0 %vm563_vm3, %v945_v35 }
 0x712   : > { %1671 = vmatpush3.bf16.xpose.msra.mxu0 %v1051_v36  ;;  %1672 = vmatprep.mubr.msk.bf16.mxu0 %vm1930_vm0, %v1929_v0 }
 0x713   : > { %1682 = vmatprep.subr.bf16.mxu0 %v1929_v0 }
 0x719   : > { %1673 = vmatmul.mubr.msk.bf16.vlgmr.msra.gmra.mrb[16].mxu0 %vm563_vm3, %v1044_v37 }
 0x71a   : > { %1684 = vmatprep.mubr.msk.bf16.mxu0 %vm1930_vm0, %v1929_v0 }
 0x7e4   : > { %v988_v40 = vpop.f32.mrb[12].mxu0 }
 0x7e5   : > { %v994_v41 = vpack.c.bf16 %v988_v40, %v988_v40  ;;  %v1662_v42 = vpop.f32.mrb[13].mxu0  ;;  %v1556_v40 = vld [vmem:[%s2343_s8] ss:$0 sm:$0xff] }
 0x7e6   : > { %v991_v43 = vpop.f32.mrb[14].mxu0 }
 0x7e7   : > { %v1663_v45 = vpop.f32.mrb[15].mxu0  ;;  %1667 = vmatmul.mubr.msk.bf16.vlgmr.msra.gmra.mrb[20].mxu1 %vm563_vm3, %v994_v41 }
 0x7e8   : > { %1678 = vmatprep.mubr.msk.bf16.mxu1 %vm1930_vm0, %v1929_v0 }
 0x7ec   : > { %v1087_v46 = vpop.f32.mrb[16].mxu0 }
 0x7ed   : > { %v1674_v47 = vpop.f32.mrb[17].mxu0  ;;  %v1093_v48 = vsel %vm563_vm3, %v1087_v46, -inf }
 0x7ee   : > { %1094 = vmax.xlane.f32.xlu0 %v1093_v48  ;;  %v1090_v49 = vpop.f32.mrb[18].mxu0 }
 0x7ef   : > { %v1675_v50 = vpop.f32.mrb[19].mxu0 }
 0x804   : > { %1105 = vrot.lane.b32.xlu0 %v2160_v44, %s1935_s24  ;;  %v1159_v44 = vsel %vm625_vm4, %v1154_v58, 0  ;;  %s1531_s24 = sshll.u32 %s458_s19, 3 }
 0x805   : > { %1683 = vmatpush3.bf16.msra.mxu0 %v1159_v44  ;;  %s460_s29 = scalar_lea.vmem [#allocation8], %s1531_s24  ;;  %s1846_s24 = sshll.u32 %s1936_s28, 4  ;;  %s1847_s24 = int_to_ptr.vmem [resolvable:$false] %s1846_s24 }
 0x806   : > { %1696 = vmatprep.subr.bf16.mxu0 %v1929_v0  ;;  %s1440_s20 = sshll.u32 %s460_s29, 4  ;;  %s1848_s17 = scalar_lea.vmem %s1847_s24, 256  ;;  %s2289_s20 = int_to_ptr.vmem [resolvable:$true] %s1440_s20 }
 0x807   : > { %s1842_s21 = scalar_lea.vmem %s2289_s20, 128  ;;  %p1849_p1 = scmp.lt.s32.totalorder %s2289_s20, %s1847_s24 }
 0x808   : > { %p1843_p8 = scmp.ne.s32.totalorder %s2289_s20, %s1842_s21  ;;  %p1850_p3 = scmp.lt.s32.totalorder %s1848_s17, %s1842_s21 }
 0x80a   : > { %p1844_p11 = pnand %p1843_p8, %p2369_p10  ;;  %p1851_p5 = por %p1850_p3, %p1849_p1 }
 0x80c   : > { %p1845_p13 = pneg %p1844_p11 }
 0x80e   : > { %p1852_p6 = pnand %p1851_p5, %p1845_p13 }
 0x87b   : > { %v1095_v51 = vpop.xlane.xlu0 %1094 }
 0x87c   : > { %v1096_v52 = vsub.f32 %v1087_v46, %v1095_v51 }
 0x87e   : > { %v1097_v53 = vmul.f32 1.442695, %v1096_v52 }
 0x87f   : > { %v1106_v54 = vpop.permute.xlu0 %1105 }
 0x880   : > { %1806 = vpow2.f32 %v1097_v53  ;;  %v1111_v55 = vsel %vm625_vm4, %v1106_v54, 0 }
 0x881   : > { %1677 = vmatpush3.bf16.msra.mxu1 %v1111_v55 }
 0x882   : > { %1688 = vmatprep.subr.bf16.mxu1 %v1929_v0 }
 0x88a   : > { %v1807_v56 = vpop.eup %1806 }
 0x88b   : > { %v1099_v57 = vsel %vm563_vm3, %v1807_v56, 0.0 }
 0x88c   : > { %1100 = vadd.xlane.f32.xlu1 %v1099_v57 }
 0x8ba   : > { %v1036_v59 = vpop.f32.mrb[20].mxu1 }
 0x8bb   : > { %v1042_v60 = vadd.f32 %v1036_v59, %v2193_v16  ;;  %v1668_v61 = vpop.f32.mrb[21].mxu1 }
 0x8bc   : > { %v1039_v62 = vpop.f32.mrb[22].mxu1 }
 0x8bd   : > { %v1669_v63 = vpop.f32.mrb[23].mxu1 }
 0x919   : > { %v1101_v1 = vpop.xlane.xlu1 %1100 }
 0x91a   : > { %1808 = vrcp.f32 %v1101_v1  ;;  %v1566_v1 = vld [vmem:[%s2346_s11] ss:$0 sm:$0xff] }
 0x924   : > { %v1809_v2 = vpop.eup %1808 }
 0x925   : > { %v1103_v4 = vmul.f32 %v1809_v2, %v1807_v56 }
 0x927   : > { %v1104_v5 = vpack.c.bf16 %v1103_v4, %v1103_v4  ;;  %v1567_v4 = vld [vmem:[%s2347_s12] ss:$0 sm:$0xff] }
 0x929   : > { %1679 = vmatmul.mubr.msk.bf16.vlgmr.msra.gmra.mrb[24].mxu1 %vm563_vm3, %v1104_v5 }
 0x92a   : > { %1692 = vmatprep.mubr.msk.bf16.mxu1 %vm1930_vm0, %v1929_v0  ;;  %1689 = vmatpush3.bf16.msra.mxu1 %v1788_v27 }
 0x92b   : > { %1690 = vmatprep.subr.bf16.mxu1 %v1929_v0 }
 0x92e   : > { %1691 = vmatpush3.bf16.msra.mxu1 %v1789_v28 }
 0x9fc   : > { %v1147_v6 = vpop.f32.mrb[24].mxu1 }
 0x9fd   : > { %v1153_v7 = vpack.c.bf16 %v1147_v6, %v1147_v6  ;;  %v1680_v8 = vpop.f32.mrb[25].mxu1 }
 0x9fe   : > { %v1150_v9 = vpop.f32.mrb[26].mxu1 }
 0x9ff   : > { %v1681_v10 = vpop.f32.mrb[27].mxu1  ;;  %1685 = vmatmul.mubr.msk.bf16.vlgmr.msra.gmra.mrb[20].mxu0 %vm563_vm3, %v1153_v7 }
 0xa00   : > { %1704 = vmatprep.mubr.msk.bf16.mxu0 %vm1930_vm0, %v1929_v0 }
 0xad2   : > { %v1195_v11 = vpop.f32.mrb[20].mxu0 }
 0xad3   : > { %v1201_v14 = vadd.f32 %v1195_v11, %v1042_v60  ;;  %v1686_v15 = vpop.f32.mrb[21].mxu0 }
 0xad4   : > { %v1198_v16 = vpop.f32.mrb[22].mxu0 }
 0xad5   : > { %v1209_v18 = vadd.f32 %v1553_v12, %v1201_v14  ;;  %v1687_v19 = vpop.f32.mrb[23].mxu0 }
 0xad7   : > { %v1210_v20 = vadd.f32 %v1209_v18, %v2117_v3  ;;  %v1790_v3 = vld [vmem:[%s2344_s9] sm:$0xff]  }
 0xad8   : > { %1697 = vmatpush3.bf16.msra.mxu0 %v1790_v3 }
 0xad9   : > { %v1212_v21 = vsel %vm495_vm1, %v1210_v20, 0.0  ;;  %1698 = vmatprep.subr.bf16.mxu0 %v1929_v0 }
 0xada   : > { %1213 = vadd.xlane.f32.xlu1 %v1212_v21 }
 0xadc   : > { %1699 = vmatpush3.bf16.msra.mxu0 %v1791_v29 }
 0xadd   : > { %1700 = vmatprep.subr.bf16.mxu0 %v1929_v0 }
 0xae0   : > { %1701 = vmatpush3.bf16.msra.mxu0 %v1792_v38 }
 0xae1   : > { %1702 = vmatprep.subr.bf16.mxu0 %v1929_v0  ;;  %v1560_v0 = vld [vmem:[%s2345_s10] ss:$0 sm:$0xff] }
 0xae4   : > { %1703 = vmatpush3.bf16.msra.mxu0 %v1793_v39 }
 0xb67   : > { %v1214_v22 = vpop.xlane.xlu1 %1213 }
 0xb68   : > { %v1216_v23 = vmul.f32 0.03125, %v1214_v22 }
 0xb6a   : > { %v1217_v24 = vsub.f32 %v1210_v20, %v1216_v23 }
 0xb6c   : > { %v1218_v25 = vmul.f32 %v1217_v24, %v1217_v24 }
 0xb6e   : > { %v1219_v26 = vsel %vm495_vm1, %v1218_v25, 0.0 }
 0xb6f   : > { %1220 = vadd.xlane.f32.xlu1 %v1219_v26 }
 0xbfc   : > { %v1221_v30 = vpop.xlane.xlu1 %1220 }
 0xbfd   : > { %v1222_v31 = vmul.f32 0.03125, %v1221_v30 }
 0xbff   : > { %v1223_v32 = vadd.f32 1e-05, %v1222_v31 }
 0xc01   : > { %1810 = vrsqrt.f32 %v1223_v32 }
 0xc0b   : > { %v1811_v33 = vpop.eup %1810 }
 0xc0c   : > { %v1225_v17 = vmul.f32 %v1811_v33, %v1217_v24 }
 0xc0e   : > { %v1233_v35 = vmul.f32 %v1554_v13, %v1225_v17 }
 0xc10   : > { %v1241_v36 = vadd.f32 %v1555_v34, %v1233_v35 }
 0xc12   : > { %v1242_v37 = vpack.c.bf16 %v1241_v36, %v1241_v36 }
 0xc14   : > { %1693 = vmatmul.mubr.msk.bf16.vlgmr.msra.gmra.mrb[28].mxu1 %vm495_vm1, %v1242_v37 }
 0xce7   : > { %v1303_v41 = vpop.f32.mrb[28].mxu1 }
 0xce8   : > { %v1304_v42 = vadd.f32 %v1556_v40, %v1303_v41  ;;  %v1694_v43 = vpop.f32.mrb[29].mxu1 }
 0xce9   : > { %v1306_v45 = vpop.f32.mrb[30].mxu1 }
 0xcea   : > { %v1309_v46 = vmax.f32 %v1304_v42, 0.0  ;;  %v1695_v47 = vpop.f32.mrb[31].mxu1 }
 0xcec   : > { %v1310_v48 = vpack.c.bf16 %v1309_v46, %v1309_v46 }
 0xcee   : > { %1705 = vmatmul.mubr.msk.bf16.vlgmr.msra.gmra.mrb[24].mxu0 %vm1350_vm5, %v1310_v48 }
 0xdc1   : > { %v1388_v49 = vpop.f32.mrb[24].mxu0 }
 0xdc2   : > { %v1389_v50 = vadd.f32 %v1560_v0, %v1388_v49  ;;  %v1706_v51 = vpop.f32.mrb[25].mxu0 }
 0xdc3   : > { %v1391_v52 = vpop.f32.mrb[26].mxu0 }
 0xdc4   : > { %v1707_v53 = vpop.f32.mrb[27].mxu0  ;;  %v1394_v54 = vadd.f32 %v1389_v50, %v1241_v36 }
 0xdc6   : > { %v1395_v55 = vsel %vm495_vm1, %v1394_v54, 0.0 }
 0xdc7   : > { %1396 = vadd.xlane.f32.xlu1 %v1395_v55 }
 0xe54   : > { %v1397_v56 = vpop.xlane.xlu1 %1396 }
 0xe55   : > { %v1398_v57 = vmul.f32 0.03125, %v1397_v56 }
 0xe57   : > { %v1399_v58 = vsub.f32 %v1394_v54, %v1398_v57 }
 0xe59   : > { %v1400_v44 = vmul.f32 %v1399_v58, %v1399_v58 }
 0xe5b   : > { %v1401_v59 = vsel %vm495_vm1, %v1400_v44, 0.0 }
 0xe5c   : > { %1402 = vadd.xlane.f32.xlu1 %v1401_v59 }
 0xee9   : > { %v1403_v60 = vpop.xlane.xlu1 %1402 }
 0xeea   : > { %v1404_v61 = vmul.f32 0.03125, %v1403_v60 }
 0xeec   : > { %v1405_v62 = vadd.f32 1e-05, %v1404_v61 }
 0xeee   : > { %1812 = vrsqrt.f32 %v1405_v62 }
 0xef8   : > { %v1813_v63 = vpop.eup %1812 }
 0xef9   : > { %v1407_v2 = vmul.f32 %v1813_v63, %v1399_v58 }
 0xefb   : > { %v1415_v5 = vmul.f32 %v1566_v1, %v1407_v2 }
 0xefd   : > { %v1423_v6 = vadd.f32 %v1567_v4, %v1415_v5 }
 0xeff   : > { %1424 = vst.msk [vmem:[%s460_s29] sm:$0xff] %vm495_vm1, %v1423_v6 }
 0xf00   : > { %1855 = shalt.err (!%p1852_p6)
}
 0xf01   : > { %s1856_s19 = scalar_lea.hbm %s2287_s15, 128  ;;  %s1860_s29 = scalar_lea.hbm %s2348_s13, 256 }
 0xf02   : > { %p1857_p7 = scmp.ne.s32.totalorder %s2287_s15, %s1856_s19  ;;  %p1861_p0 = scmp.lt.u32.totalorder %s2287_s15, %s2348_s13 }
 0xf03   : > { %p1862_p2 = scmp.lt.u32.totalorder %s1860_s29, %s1856_s19  ;;  %p1864_p8 = scmp.lt.u32.totalorder %s1856_s19, %s2287_s15 }
 0xf04   : > { %p1858_p9 = pnand %p1857_p7, %p2369_p10 }
 0xf05   : > { %p1863_p4 = por %p1862_p2, %p1861_p0 }
 0xf06   : > { %p1859_p12 = pneg %p1858_p9 }
 0xf07   : > { %p1865_p11 = por %p1864_p8, %p1863_p4 }
 0xf09   : > { %p1866_p13 = pnand %p1865_p11, %p1859_p12 }
 0xf0b   : > { %1869 = shalt.err (!%p1866_p13)
}
 0xf0c   : > { %1712 = dma.vmem_to_hbm [thread:$0]  (%p2369_p10), %s2289_s20, 128, %s2287_s15, %s1426_s16  }
 0xf0d PF: > { %s2370_s21 = sld [smem:[#allocation14_spill]]  ;;  %p1724_p1 = scmp.ge.s32.totalorder %s1924_s30, 2 }
 0xf0e   : > { %s1452_s28 = sand.u32 1, %s1904_s25  }
 0xf0f   : > { %s1453_s24 = scalar_lea.sflag [#allocation7], %s1452_s28 }
 0xf13   : > { %p2371_p3 = scmp.ne.s32.totalorder %s2370_s21, 0 }
 0xf15   : > { %p1719_p5 = pnand %p1724_p1, %p2371_p3 }
 0xf17   : > { %1899 = dma.done.wait (!%p1719_p5), %s1453_s24, 128  }
 0xf18   : > { %1901 = vsyncadd (!%p1719_p5), %s1453_s24, 4294967168  ;;  %s27_s30 = sadd.s32 1, %s1924_s30   ;;  %s2372_s17 = sld [smem:[#allocation11_spill]] }
 0xf19   : > { %p24_p6 = scmp.ge.s32.totalorder %s27_s30, 4   ;;  %s2373_s27 = sld [smem:[#allocation15_spill]] }
 0xf1a   : > { %s2374_s28 = sld [smem:[#allocation12_spill]]  ;;  %s2375_s29 = sld [smem:[#allocation13_spill]] }
 0xf1b   : > { %s2376_s25 = smov %s1908_s26  ;;  %26 = sbr.rel (!%p24_p6) target bundleno = 5 (0x5), region = 118 }
 0xf1e   : > { %s2377_s26 = smov %s2372_s17 }
 0xf22   :  { %1458 = vsyncpa [#allocation6], 1 }
 0xf23   :  { %1460 = vsyncpa [#allocation6 + $0x1], 1 }
 0xf24   :  { %1461 = vsyncpa [#allocation7], 1 }
 0xf25   :  { %1463 = vsyncpa [#allocation7 + $0x1], 1 }

</bundles_post_ra>
